<compile_context>
chip_gen: v7x
topology: tpu7x:2x2x1
jax: 0.10.0
libtpu: 0.0.40
codegen_flags: <defaults>
</compile_context>

<pallas_src>
import jax
import jax.numpy as jnp
import numpy as np
from jax.experimental import pallas as pl
from jax.experimental.pallas import tpu as pltpu

_LANE = 128      # lane width (last dim)
_SUBLANE = 8     # f32 sublane height (second-to-last dim)


def _round_up(n, m):
    return ((n + m - 1) // m) * m


# ---------------------------------------------------------------------------
# Kernel
# ---------------------------------------------------------------------------
def _mlp_kernel(x_ref, w1_ref, b1_ref, w2_ref, b2_ref, w3_ref, b3_ref, o_ref):
    # x arrives in f32 (no padded bf16 copy materialized in HBM); cast on the
    # VPU just before the MXU. Accumulation, bias adds and LeakyReLU stay f32.
    x = x_ref[...].astype(w1_ref.dtype)

    # fc1 + LeakyReLU(negative_slope=0.99)
    h1 = jnp.dot(x, w1_ref[...], preferred_element_type=jnp.float32) + b1_ref[...]
    h1 = jnp.where(h1 >= 0, h1, 0.99 * h1)
    # dropout1: identity (eval mode)

    # fc2 + LeakyReLU(negative_slope=0.001)
    h2 = jnp.dot(h1.astype(w2_ref.dtype), w2_ref[...],
                 preferred_element_type=jnp.float32) + b2_ref[...]
    h2 = jnp.where(h2 >= 0, h2, 0.001 * h2)
    # dropout2: identity (eval mode)

    # fc3
    out = jnp.dot(h2.astype(w3_ref.dtype), w3_ref[...],
                  preferred_element_type=jnp.float32) + b3_ref[...]
    o_ref[...] = out.astype(o_ref.dtype)


# ---------------------------------------------------------------------------
# Per-generation sizing helpers
# ---------------------------------------------------------------------------
def _vmem_budget_bytes():
    """~75% of per-core VMEM (leave headroom for Mosaic internal scratch)."""
    try:
        cap = int(pltpu.get_tpu_info().vmem_capacity_bytes)
        return int(cap * 0.75)
    except Exception:
        # Conservative fallback that fits v7x's 64 MiB per-TensorCore VMEM.
        return 48 * 1024 * 1024


def _num_tensorcores():
    """2 TensorCores per chip on v7x-class devices, else 1."""
    try:
        kind = jax.devices()[0].device_kind.lower()
    except Exception:
        return 1
    return 2 if "7" in kind else 1


def _pick_tile_b(b8, per_row_bytes, weight_bytes, vmem_budget, num_tc):
    """Largest batch tile (multiple of 8) fitting the VMEM budget, with evenly
    sized grid steps to minimize zero-row padding. On 2-TC chips prefer an even
    step count so both TensorCores get equal work."""
    avail = max(vmem_budget - weight_bytes - (4 << 20), per_row_bytes * _SUBLANE)
    tile_max = max(_SUBLANE, (avail // per_row_bytes) // _SUBLANE * _SUBLANE)
    tile_max = min(tile_max, b8, 4096)

    steps = -(-b8 // tile_max)  # ceil
    if num_tc == 2 and b8 >= 2 * _SUBLANE:
        steps = max(steps, 2)
        if steps % 2:
            steps += 1
    # Evenly sized tiles -> padding < 8 * steps rows instead of up to a tile.
    return _round_up(-(-b8 // steps), _SUBLANE)


# ---------------------------------------------------------------------------
# Params: init + one-time padding / casting
# ---------------------------------------------------------------------------
def init_params(key, input_size, hidden_size_1, hidden_size_2, output_size):
    """Deterministic init mimicking nn.Linear's U(-1/sqrt(fan_in), 1/sqrt(fan_in)).
    Weights stored transposed ([in, out]) relative to PyTorch's [out, in]."""
    ks = jax.random.split(key, 6)

    def lin(kw, kb, fan_in, fan_out):
        bound = 1.0 / jnp.sqrt(jnp.float32(fan_in))
        w = jax.random.uniform(kw, (fan_in, fan_out), jnp.float32, -bound, bound)
        b = jax.random.uniform(kb, (1, fan_out), jnp.float32, -bound, bound)
        return w, b

    w1, b1 = lin(ks[0], ks[1], input_size, hidden_size_1)
    w2, b2 = lin(ks[2], ks[3], hidden_size_1, hidden_size_2)
    w3, b3 = lin(ks[4], ks[5], hidden_size_2, output_size)
    return {"w1": w1, "b1": b1, "w2": w2, "b2": b2, "w3": w3, "b3": b3}


def prepare_params(params, *, compute_dtype=jnp.bfloat16):
    """One-time: pad hidden/output dims to 128 lanes (lane-dense MXU/store path)
    and cast weights to the compute dtype. w1 keeps its unpadded contraction dim
    so x needs no feature padding. Zero padding preserves the math
    (LeakyReLU(0) == 0; padded rows/cols contribute 0)."""
    w1, b1, w2, b2, w3, b3 = (params[k] for k in ("w1", "b1", "w2", "b2", "w3", "b3"))
    d_in, h1 = w1.shape
    h2 = w2.shape[1]
    d_out = w3.shape[1]
    h1_p, h2_p, d_out_p = (_round_up(n, _LANE) for n in (h1, h2, d_out))

    def pad2(a, rows, cols):
        return jnp.pad(a, ((0, rows - a.shape[0]), (0, cols - a.shape[1])))

    return {
        "w1": pad2(w1, d_in, h1_p).astype(compute_dtype),
        "b1": pad2(b1, 1, h1_p).astype(jnp.float32),
        "w2": pad2(w2, h1_p, h2_p).astype(compute_dtype),
        "b2": pad2(b2, 1, h2_p).astype(jnp.float32),
        "w3": pad2(w3, h2_p, d_out_p).astype(compute_dtype),
        "b3": pad2(b3, 1, d_out_p).astype(jnp.float32),
        "dims": (int(d_in), int(h1), int(h2), int(d_out)),
    }


# ---------------------------------------------------------------------------
# Forward
# ---------------------------------------------------------------------------
def dnn_forward(x, prepared, *, tile_b=None, out_dtype=jnp.float32):
    """Fused MLP forward. x: [B, d_in] f32; prepared: output of prepare_params."""
    d_in, h1, h2, d_out = prepared["dims"]
    w1, b1, w2, b2, w3, b3 = (prepared[k] for k in ("w1", "b1", "w2", "b2", "w3", "b3"))
    h1_p, h2_p, d_out_p = w1.shape[1], w2.shape[1], w3.shape[1]

    B = x.shape[0]
    assert x.shape[1] == d_in, "input feature dim mismatch"

    out_itemsize = np.dtype(out_dtype).itemsize
    weight_bytes = sum(int(a.size) * a.dtype.itemsize
                       for a in (w1, b1, w2, b2, w3, b3))
    # Per-batch-row VMEM cost: f32 x tile (x2 buffers) + out tile (x2 buffers)
    # + bf16 x cast + f32 intermediates; 1.2x slack for compiler temporaries.
    per_row_bytes = int(1.2 * (d_in * 4 * 2
                               + d_out_p * out_itemsize * 2
                               + d_in * 2
                               + (h1_p + h2_p + d_out_p) * 4))
    budget = _vmem_budget_bytes()

    b8 = _round_up(B, _SUBLANE)
    if tile_b is None:
        tile_b = _pick_tile_b(b8, per_row_bytes, weight_bytes, budget,
                              _num_tensorcores())
    tile_b = max(_SUBLANE, _round_up(tile_b, _SUBLANE))
    B_p = _round_up(b8, tile_b)
    grid = (B_p // tile_b,)

    # Batch-only zero padding; x stays f32 (cast to bf16 inside the kernel).
    x_p = jnp.pad(x, ((0, B_p - B), (0, 0)))

    resident = lambda i: (0, 0)  # weights/biases resident across all batch tiles

    def res_spec(shape):
        # Constant index_map -> no double buffering needed.
        return pl.BlockSpec(shape, resident, pipeline_mode=pl.Buffered(1))

    flops = 2 * B_p * (d_in * h1_p + h1_p * h2_p + h2_p * d_out_p)
    bytes_accessed = (int(x_p.size) * 4
                      + weight_bytes
                      + B_p * d_out_p * out_itemsize)
    cost = pl.CostEstimate(flops=flops, transcendentals=0,
                           bytes_accessed=bytes_accessed)

    out_padded = pl.pallas_call(
        _mlp_kernel,
        out_shape=jax.ShapeDtypeStruct((B_p, d_out_p), out_dtype),
        grid_spec=pltpu.PrefetchScalarGridSpec(
            num_scalar_prefetch=0,
            grid=grid,
            in_specs=[
                pl.BlockSpec((tile_b, d_in), lambda i: (i, 0)),
                res_spec((d_in, h1_p)),
                res_spec((1, h1_p)),
                res_spec((h1_p, h2_p)),
                res_spec((1, h2_p)),
                res_spec((h2_p, d_out_p)),
                res_spec((1, d_out_p)),
            ],
            out_specs=pl.BlockSpec((tile_b, d_out_p), lambda i: (i, 0)),
        ),
        compiler_params=pltpu.CompilerParams(
            dimension_semantics=("parallel",),
            vmem_limit_bytes=int(budget),
        ),
        cost_estimate=cost,
    )(x_p, w1, b1, w2, b2, w3, b3)

    return out_padded[:B, :d_out]


# ---------------------------------------------------------------------------
# References
# ---------------------------------------------------------------------------
def reference_forward_f32(x, params):
    """True-f32 PyTorch-equivalent forward (eval mode)."""
    h1 = x @ params["w1"] + params["b1"]
    h1 = jnp.where(h1 >= 0, h1, 0.99 * h1)
    h2 = h1 @ params["w2"] + params["b2"]
    h2 = jnp.where(h2 >= 0, h2, 0.001 * h2)
    return h2 @ params["w3"] + params["b3"]


def reference_forward_matched(x, params, *, compute_dtype=jnp.bfloat16):
    """Same bf16-operand / f32-accumulate compute path as the kernel."""
    cd = compute_dtype
    h1 = jnp.dot(x.astype(cd), params["w1"].astype(cd),
                 preferred_element_type=jnp.float32) + params["b1"]
    h1 = jnp.where(h1 >= 0, h1, 0.99 * h1)
    h2 = jnp.dot(h1.astype(cd), params["w2"].astype(cd),
                 preferred_element_type=jnp.float32) + params["b2"]
    h2 = jnp.where(h2 >= 0, h2, 0.001 * h2)
    return jnp.dot(h2.astype(cd), params["w3"].astype(cd),
                   preferred_element_type=jnp.float32) + params["b3"]


if __name__ == "__main__":
    # Small, forward-consistent shapes.
    batch = 64
    input_size = 32
    hidden_size_1 = 64
    hidden_size_2 = 64
    output_size = 16

    key = jax.random.PRNGKey(0)
    kx, kp = jax.random.split(key)
    x = jax.random.normal(kx, (batch, input_size), jnp.float32)
    params = init_params(kp, input_size, hidden_size_1, hidden_size_2, output_size)

    prepared = prepare_params(params)          # pad + cast weights ONCE
    out = dnn_forward(x, prepared)
    out = jax.block_until_ready(out)
    assert out.shape == (batch, output_size)

    # Bit-level parity against a reference using the identical bf16/f32 path.
    ref_matched = reference_forward_matched(x, params)
    assert jnp.allclose(out, ref_matched, atol=1e-3, rtol=1e-3), \
        "mismatch vs bf16-matched reference"

    # Accuracy against the true f32 PyTorch forward (bf16 operand rounding only).
    ref_f32 = reference_forward_f32(x, params)
    assert jnp.allclose(out, ref_f32, atol=2e-2, rtol=2e-2), \
        "mismatch vs f32 reference"

    print("KERNEL_OK")
</pallas_src>

<mosaic_0001>
module attributes {stable_mosaic.version = 11 : i64} {
  func.func @_mlp_kernel(%arg0: i32, %arg1: memref<64x32xf32, #tpu.memory_space<vmem>>, %arg2: memref<32x128xbf16, #tpu.memory_space<vmem>>, %arg3: memref<1x128xf32, #tpu.memory_space<vmem>>, %arg4: memref<128x128xbf16, #tpu.memory_space<vmem>>, %arg5: memref<1x128xf32, #tpu.memory_space<vmem>>, %arg6: memref<128x128xbf16, #tpu.memory_space<vmem>>, %arg7: memref<1x128xf32, #tpu.memory_space<vmem>>, %arg8: memref<64x128xf32, #tpu.memory_space<vmem>>) attributes {dimension_semantics = [#tpu.dimension_semantics<parallel>], iteration_bounds = array<i64: 1>, scalar_prefetch = 0 : i64, scratch_operands = 0 : i64, tpu.core_type = #tpu.core_type<tc>, window_params = [{transform_indices = @transform_0, window_bounds = array<i64: 64, 32>}, {pipeline_mode = #tpu.pipeline_mode<synchronous>, transform_indices = @transform_1, window_bounds = array<i64: 32, 128>}, {pipeline_mode = #tpu.pipeline_mode<synchronous>, transform_indices = @transform_2, window_bounds = array<i64: 1, 128>}, {pipeline_mode = #tpu.pipeline_mode<synchronous>, transform_indices = @transform_3, window_bounds = array<i64: 128, 128>}, {pipeline_mode = #tpu.pipeline_mode<synchronous>, transform_indices = @transform_4, window_bounds = array<i64: 1, 128>}, {pipeline_mode = #tpu.pipeline_mode<synchronous>, transform_indices = @transform_5, window_bounds = array<i64: 128, 128>}, {pipeline_mode = #tpu.pipeline_mode<synchronous>, transform_indices = @transform_6, window_bounds = array<i64: 1, 128>}, {transform_indices = @transform_7, window_bounds = array<i64: 64, 128>}]} {
    %c0 = arith.constant 0 : index
    %c0_0 = arith.constant 0 : index
    %0 = vector.load %arg1[%c0, %c0_0] : memref<64x32xf32, #tpu.memory_space<vmem>>, vector<64x32xf32>
    %1 = arith.truncf %0 : vector<64x32xf32> to vector<64x32xbf16>
    %c0_1 = arith.constant 0 : index
    %c0_2 = arith.constant 0 : index
    %2 = vector.load %arg2[%c0_1, %c0_2] : memref<32x128xbf16, #tpu.memory_space<vmem>>, vector<32x128xbf16>
    %cst = arith.constant dense<0.000000e+00> : vector<64x128xf32>
    %3 = tpu.matmul %1, %2, %cst {dimension_numbers = #tpu.dot_dimension_numbers<[1], [0], [0], [1], [0, 0, 1, 1], [], []>} : vector<64x32xbf16>, vector<32x128xbf16>, vector<64x128xf32> -> vector<64x128xf32>
    %c0_3 = arith.constant 0 : index
    %c0_4 = arith.constant 0 : index
    %4 = vector.load %arg3[%c0_3, %c0_4] : memref<1x128xf32, #tpu.memory_space<vmem>>, vector<1x128xf32>
    %5 = vector.broadcast %4 : vector<1x128xf32> to vector<64x128xf32>
    %6 = arith.addf %3, %5 : vector<64x128xf32>
    %cst_5 = arith.constant 0.000000e+00 : f32
    %7 = vector.broadcast %cst_5 : f32 to vector<64x128xf32>
    %8 = arith.cmpf oge, %6, %7 : vector<64x128xf32>
    %cst_6 = arith.constant 9.900000e-01 : f32
    %9 = vector.broadcast %cst_6 : f32 to vector<64x128xf32>
    %10 = arith.mulf %9, %6 : vector<64x128xf32>
    %11 = arith.select %8, %6, %10 : vector<64x128xi1>, vector<64x128xf32>
    %12 = arith.truncf %11 : vector<64x128xf32> to vector<64x128xbf16>
    %c0_7 = arith.constant 0 : index
    %c0_8 = arith.constant 0 : index
    %13 = vector.load %arg4[%c0_7, %c0_8] : memref<128x128xbf16, #tpu.memory_space<vmem>>, vector<128x128xbf16>
    %cst_9 = arith.constant dense<0.000000e+00> : vector<64x128xf32>
    %14 = tpu.matmul %12, %13, %cst_9 {dimension_numbers = #tpu.dot_dimension_numbers<[1], [0], [0], [1], [0, 0, 1, 1], [], []>} : vector<64x128xbf16>, vector<128x128xbf16>, vector<64x128xf32> -> vector<64x128xf32>
    %c0_10 = arith.constant 0 : index
    %c0_11 = arith.constant 0 : index
    %15 = vector.load %arg5[%c0_10, %c0_11] : memref<1x128xf32, #tpu.memory_space<vmem>>, vector<1x128xf32>
    %16 = vector.broadcast %15 : vector<1x128xf32> to vector<64x128xf32>
    %17 = arith.addf %14, %16 : vector<64x128xf32>
    %cst_12 = arith.constant 0.000000e+00 : f32
    %18 = vector.broadcast %cst_12 : f32 to vector<64x128xf32>
    %19 = arith.cmpf oge, %17, %18 : vector<64x128xf32>
    %cst_13 = arith.constant 1.000000e-03 : f32
    %20 = vector.broadcast %cst_13 : f32 to vector<64x128xf32>
    %21 = arith.mulf %20, %17 : vector<64x128xf32>
    %22 = arith.select %19, %17, %21 : vector<64x128xi1>, vector<64x128xf32>
    %23 = arith.truncf %22 : vector<64x128xf32> to vector<64x128xbf16>
    %c0_14 = arith.constant 0 : index
    %c0_15 = arith.constant 0 : index
    %24 = vector.load %arg6[%c0_14, %c0_15] : memref<128x128xbf16, #tpu.memory_space<vmem>>, vector<128x128xbf16>
    %cst_16 = arith.constant dense<0.000000e+00> : vector<64x128xf32>
    %25 = tpu.matmul %23, %24, %cst_16 {dimension_numbers = #tpu.dot_dimension_numbers<[1], [0], [0], [1], [0, 0, 1, 1], [], []>} : vector<64x128xbf16>, vector<128x128xbf16>, vector<64x128xf32> -> vector<64x128xf32>
    %c0_17 = arith.constant 0 : index
    %c0_18 = arith.constant 0 : index
    %26 = vector.load %arg7[%c0_17, %c0_18] : memref<1x128xf32, #tpu.memory_space<vmem>>, vector<1x128xf32>
    %27 = vector.broadcast %26 : vector<1x128xf32> to vector<64x128xf32>
    %28 = arith.addf %25, %27 : vector<64x128xf32>
    %c0_19 = arith.constant 0 : index
    %c0_20 = arith.constant 0 : index
    %29 = vector.load %arg8[%c0_19, %c0_20] : memref<64x128xf32, #tpu.memory_space<vmem>>, vector<64x128xf32>
    tpu.vector_store %arg8[%c0_19, %c0_20], %28 {strides = array<i32>} : memref<64x128xf32, #tpu.memory_space<vmem>>, vector<64x128xf32>,
    return
  }
  func.func @transform_0(%arg0: i32) -> (i32, i32) {
    %c0_i32 = arith.constant 0 : i32
    %c0_i32_0 = arith.constant 0 : i32
    return %arg0, %c0_i32 : i32, i32
  }
  func.func @transform_1(%arg0: i32) -> (i32, i32) {
    %c0_i32 = arith.constant 0 : i32
    %c0_i32_0 = arith.constant 0 : i32
    %c0_i32_1 = arith.constant 0 : i32
    return %c0_i32, %c0_i32_0 : i32, i32
  }
  func.func @transform_2(%arg0: i32) -> (i32, i32) {
    %c0_i32 = arith.constant 0 : i32
    %c0_i32_0 = arith.constant 0 : i32
    %c0_i32_1 = arith.constant 0 : i32
    return %c0_i32, %c0_i32_0 : i32, i32
  }
  func.func @transform_3(%arg0: i32) -> (i32, i32) {
    %c0_i32 = arith.constant 0 : i32
    %c0_i32_0 = arith.constant 0 : i32
    %c0_i32_1 = arith.constant 0 : i32
    return %c0_i32, %c0_i32_0 : i32, i32
  }
  func.func @transform_4(%arg0: i32) -> (i32, i32) {
    %c0_i32 = arith.constant 0 : i32
    %c0_i32_0 = arith.constant 0 : i32
    %c0_i32_1 = arith.constant 0 : i32
    return %c0_i32, %c0_i32_0 : i32, i32
  }
  func.func @transform_5(%arg0: i32) -> (i32, i32) {
    %c0_i32 = arith.constant 0 : i32
    %c0_i32_0 = arith.constant 0 : i32
    %c0_i32_1 = arith.constant 0 : i32
    return %c0_i32, %c0_i32_0 : i32, i32
  }
  func.func @transform_6(%arg0: i32) -> (i32, i32) {
    %c0_i32 = arith.constant 0 : i32
    %c0_i32_0 = arith.constant 0 : i32
    %c0_i32_1 = arith.constant 0 : i32
    return %c0_i32, %c0_i32_0 : i32, i32
  }
  func.func @transform_7(%arg0: i32) -> (i32, i32) {
    %c0_i32 = arith.constant 0 : i32
    %c0_i32_0 = arith.constant 0 : i32
    return %arg0, %c0_i32 : i32, i32
  }
}

</mosaic_0001>

<bundles_post_ra>
// kernel: tpu_custom_call.1
= control target key start
LH: loop header
LB: loop body
LE: loop exit
PB: predicated region body
PF: predicated region fallthrough
CT: control target
= control target key end

     0   :  { %12 = vsyncpa [#allocation3], 0  ;;  %s832_s0 = inlined_call_operand.vmem [shape: f32[64,32], index: 0, kind: input, shape index: {}]   ;;  %s833_s1 = inlined_call_operand.vmem [shape: bf16[32,128], index: 1, kind: input, shape index: {}]   ;;  %s834_s2 = inlined_call_operand.vmem [shape: f32[1,128], index: 2, kind: input, shape index: {}]   ;;  %s835_s3 = inlined_call_operand.vmem [shape: bf16[128,128], index: 3, kind: input, shape index: {}]   ;;  %s836_s4 = inlined_call_operand.vmem [shape: f32[1,128], index: 4, kind: input, shape index: {}]   ;;  %s837_s5 = inlined_call_operand.hbm [shape: bf16[128,128], index: 5, kind: input, shape index: {}]   ;;  %s838_s6 = inlined_call_operand.vmem [shape: f32[1,128], index: 6, kind: input, shape index: {}]   ;;  %s839_s7 = inlined_call_operand.hbm [shape: f32[64,128], index: 7, kind: output, shape index: {}]  }
   0x1   :  { %13 = vsyncpa [#allocation4], 0  ;;  %s695_s24 = smov [#allocation2]   ;;  %s647_s28 = scalar_lea.hbm %s837_s5, 1024 }
   0x2   :  { %s29_s25 = sshll.u32 %s695_s24, 4  ;;  %p648_p0 = scmp.ne.s32.totalorder %s837_s5, %s647_s28  ;;  %s30_s25 = int_to_ptr.vmem [resolvable:$true] %s29_s25 }
   0x3   :  { %p651_p1 = scmp.lt.u32.totalorder %s647_s28, %s837_s5 }
   0x5   :  { %p653_p2 = pnand %p651_p1, %p648_p0 }
   0x7   :  { %656 = shalt.err (!%p653_p2)
}
   0x8   :  { %s657_s10 = scalar_lea.vmem %s30_s25, 1024  ;;  %p662_p4 = scmp.lt.s32.totalorder %s30_s25, %s30_s25 }
   0x9   :  { %p658_p3 = scmp.ne.s32.totalorder %s30_s25, %s657_s10  ;;  %p663_p5 = scmp.lt.s32.totalorder %s657_s10, %s657_s10 }
   0xb   :  { %p664_p6 = por %p663_p5, %p662_p4 }
   0xd   :  { %p665_p7 = pnand %p664_p6, %p658_p3 }
   0xf   :  { %668 = shalt.err (!%p665_p7)
}
  0x10   :  { %s696_s11 = smov 64   ;;  %s697_s12 = smov 4  }
  0x11   :  { %35 = dma.hbm_to_vmem [thread:$0]  %s837_s5, 1024, %s30_s25, [#allocation3], %s696_s11, %s696_s11, %s697_s12  }
  0x12   :  { %691 = dma.done.wait [#allocation3], 1024  }
  0x13   :  { %692 = vsyncadd [#allocation3], 4294966272  ;;  %v629_v0 = vld [vmem:[%s833_s1] sm:$0xff]   ;;  %v630_v1 = vld [vmem:[%s833_s1 + $0x8] sm:$0xff]   ;;  %vm77_vm0 = vcmask 261120   ;;  %s698_s26 = smov [#allocation5]  }
  0x14   :  { %563 = vmatprep.subr.bf16.mxu0 %v629_v0  ;;  %v42_v2 = vld [vmem:[%s832_s0] sm:$0xff]  ;;  %v43_v3 = vld [vmem:[%s832_s0 + $0x8] sm:$0xff]  ;;  %v44_v5 = vld [vmem:[%s832_s0 + $0x10] sm:$0xff]  ;;  %s496_s27 = sshll.u32 %s698_s26, 4  ;;  %s497_s27 = int_to_ptr.vmem [resolvable:$true] %s496_s27 }
  0x15   :  { %564 = vmatpush3.bf16.msra.mxu0 %v629_v0  ;;  %v50_v4 = vpack.c.bf16 %v43_v3, %v42_v2  ;;  %v45_v6 = vld [vmem:[%s832_s0 + $0x18] sm:$0xff]  ;;  %v46_v7 = vld [vmem:[%s832_s0 + $0x20] sm:$0xff]  ;;  %v47_v8 = vld [vmem:[%s832_s0 + $0x28] sm:$0xff]  ;;  %p674_p9 = scmp.lt.s32.totalorder %s497_s27, %s497_s27 }
  0x16   :  { %565 = vmatprep.subr.bf16.mxu0 %v630_v1  ;;  %v631_v9 = vld [vmem:[%s835_s3] sm:$0xff]   ;;  %v51_v10 = vpack.c.bf16 %v45_v6, %v44_v5  ;;  %v632_v11 = vld [vmem:[%s835_s3 + $0x8] sm:$0xff]   ;;  %v52_v12 = vpack.c.bf16 %v47_v8, %v46_v7  ;;  %v48_v13 = vld [vmem:[%s832_s0 + $0x30] sm:$0xff] }
  0x17   :  { %567 = vmatprep.mubr.msk.bf16.mxu0 %vm77_vm0, %v50_v4  ;;  %575 = vmatprep.subr.bf16.mxu1 %v631_v9  ;;  %v49_v14 = vld [vmem:[%s832_s0 + $0x38] sm:$0xff]  ;;  %v633_v15 = vld [vmem:[%s835_s3 + $0x10] sm:$0xff]   ;;  %v635_v18 = vld [vmem:[%s835_s3 + $0x20] sm:$0xff]  }
  0x18   :  { %576 = vmatpush3.bf16.msra.mxu1 %v631_v9  ;;  %v634_v16 = vld [vmem:[%s835_s3 + $0x18] sm:$0xff]   ;;  %v53_v17 = vpack.c.bf16 %v49_v14, %v48_v13  ;;  %v636_v19 = vld [vmem:[%s835_s3 + $0x28] sm:$0xff]   ;;  %v637_v20 = vld [vmem:[%s835_s3 + $0x30] sm:$0xff]  }
  0x19   :  { %566 = vmatpush3.bf16.msra.mxu0 %v630_v1  ;;  %577 = vmatprep.subr.bf16.mxu1 %v632_v11  ;;  %v638_v21 = vld [vmem:[%s835_s3 + $0x38] sm:$0xff]   ;;  %v639_v22 = vld [vmem:[#allocation2] sm:$0xff]   ;;  %v640_v23 = vld [vmem:[#allocation2 + $0x8] sm:$0xff]  }
  0x1a   :  { %599 = vmatprep.subr.bf16.mxu0 %v639_v22  ;;  %v641_v24 = vld [vmem:[#allocation2 + $0x10] sm:$0xff]   ;;  %v642_v25 = vld [vmem:[#allocation2 + $0x18] sm:$0xff]   ;;  %v643_v26 = vld [vmem:[#allocation2 + $0x20] sm:$0xff]  }
  0x1b   :  { %v508_v27 = vld [vmem:[%s834_s2] ss:$0 sm:$0xff]  ;;  %v644_v0 = vld [vmem:[#allocation2 + $0x28] sm:$0xff]   ;;  %v645_v1 = vld [vmem:[#allocation2 + $0x30] sm:$0xff]  }
  0x1c   :  { %568 = vmatmul.mubr.msk.bf16.vlgmr.msra.gmra.mrb[0].mxu0 %vm77_vm0, %v51_v10  ;;  %578 = vmatpush3.bf16.msra.mxu1 %v632_v11  ;;  %v646_v2 = vld [vmem:[#allocation2 + $0x38] sm:$0xff]   ;;  %v515_v3 = vld [vmem:[%s836_s4] ss:$0 sm:$0xff] }
  0x1d   :  { %571 = vmatprep.mubr.msk.bf16.mxu0 %vm77_vm0, %v52_v12  ;;  %579 = vmatprep.subr.bf16.mxu1 %v633_v15 }
  0x1e   :  { %600 = vmatpush3.bf16.msra.mxu0 %v639_v22 }
  0x1f   :  { %601 = vmatprep.subr.bf16.mxu0 %v640_v23 }
  0x20   :  { %580 = vmatpush3.bf16.msra.mxu1 %v633_v15 }
  0x21   :  { %581 = vmatprep.subr.bf16.mxu1 %v634_v16 }
  0x22   :  { %602 = vmatpush3.bf16.msra.mxu0 %v640_v23 }
  0x23   :  { %603 = vmatprep.subr.bf16.mxu0 %v641_v24 }
  0x24   :  { %572 = vmatmul.mubr.msk.bf16.gmra.mrb[4].mxu0 %vm77_vm0, %v53_v17  ;;  %582 = vmatpush3.bf16.msra.mxu1 %v634_v16 }
  0x25   :  { %583 = vmatprep.subr.bf16.mxu1 %v635_v18 }
  0x26   :  { %604 = vmatpush3.bf16.msra.mxu0 %v641_v24 }
  0x27   :  { %605 = vmatprep.subr.bf16.mxu0 %v642_v25 }
  0x28   :  { %584 = vmatpush3.bf16.msra.mxu1 %v635_v18 }
  0x29   :  { %585 = vmatprep.subr.bf16.mxu1 %v636_v19 }
  0x2a   :  { %606 = vmatpush3.bf16.msra.mxu0 %v642_v25 }
  0x2b   :  { %607 = vmatprep.subr.bf16.mxu0 %v643_v26 }
  0x2c   :  { %586 = vmatpush3.bf16.msra.mxu1 %v636_v19 }
  0x2d   :  { %587 = vmatprep.subr.bf16.mxu1 %v637_v20 }
  0x2e   :  { %608 = vmatpush3.bf16.msra.mxu0 %v643_v26 }
  0x2f   :  { %609 = vmatprep.subr.bf16.mxu0 %v644_v0 }
  0x30   :  { %588 = vmatpush3.bf16.msra.mxu1 %v637_v20 }
  0x31   :  { %589 = vmatprep.subr.bf16.mxu1 %v638_v21 }
  0x32   :  { %610 = vmatpush3.bf16.msra.mxu0 %v644_v0 }
  0x33   :  { %611 = vmatprep.subr.bf16.mxu0 %v645_v1 }
  0x34   :  { %590 = vmatpush3.bf16.msra.mxu1 %v638_v21 }
  0x36   :  { %612 = vmatpush3.bf16.msra.mxu0 %v645_v1 }
  0x37   :  { %613 = vmatprep.subr.bf16.mxu0 %v646_v2 }
  0x3a   :  { %614 = vmatpush3.bf16.msra.mxu0 %v646_v2 }
  0xef   :  { %v569_v28 = vpop.f32.mrb[0].mxu0 }
  0xf0   :  { %v133_v29 = vadd.f32 %v569_v28, %v508_v27  ;;  %v124_v30 = vpop.f32.mrb[1].mxu0 }
  0xf1   :  { %v125_v31 = vadd.f32 %v508_v27, %v124_v30  ;;  %v570_v32 = vpop.f32.mrb[2].mxu0 }
  0xf2   :  { %v165_v33 = vmul.f32 0.99, %v133_v29  ;;  %v136_v34 = vadd.f32 %v570_v32, %v508_v27  ;;  %v127_v35 = vpop.f32.mrb[3].mxu0  ;;  %vm157_vm1 = vcmp.ge.f32.partialorder %v133_v29, 0.0 }
  0xf3   :  { %v163_v36 = vmul.f32 0.99, %v125_v31  ;;  %v128_v37 = vadd.f32 %v508_v27, %v127_v35  ;;  %vm155_vm3 = vcmp.ge.f32.partialorder %v125_v31, 0.0 }
  0xf4   :  { %vm158_vm2 = vcmp.ge.f32.partialorder %v136_v34, 0.0  ;;  %v166_v38 = vmul.f32 0.99, %v136_v34  ;;  %v173_v40 = vsel %vm157_vm1, %v133_v29, %v165_v33 }
  0xf5   :  { %v164_v39 = vmul.f32 0.99, %v128_v37  ;;  %vm156_vm4 = vcmp.ge.f32.partialorder %v128_v37, 0.0  ;;  %v171_v43 = vsel %vm155_vm3, %v125_v31, %v163_v36 }
  0xf6   :  { %v174_v41 = vsel %vm158_vm2, %v136_v34, %v166_v38 }
  0xf7   :  { %v573_v42 = vpop.f32.mrb[4].mxu0  ;;  %v172_v44 = vsel %vm156_vm4, %v128_v37, %v164_v39  ;;  %v180_v45 = vpack.c.bf16 %v174_v41, %v173_v40  ;;  %v524_v40 = vld [vmem:[%s838_s6] ss:$0 sm:$0xff]  ;;  %s669_s6 = scalar_lea.vmem %s497_s27, 1024 }
  0xf8   :  { %v149_v46 = vadd.f32 %v573_v42, %v508_v27  ;;  %v140_v47 = vpop.f32.mrb[5].mxu0  ;;  %v179_v48 = vpack.c.bf16 %v172_v44, %v171_v43  ;;  %p670_p8 = scmp.ne.s32.totalorder %s497_s27, %s669_s6  ;;  %p675_p10 = scmp.lt.s32.totalorder %s669_s6, %s669_s6 }
  0xf9   :  { %v141_v49 = vadd.f32 %v508_v27, %v140_v47  ;;  %v574_v50 = vpop.f32.mrb[6].mxu0 }
  0xfa   :  { %v169_v51 = vmul.f32 0.99, %v149_v46  ;;  %v152_v52 = vadd.f32 %v574_v50, %v508_v27  ;;  %v143_v53 = vpop.f32.mrb[7].mxu0  ;;  %591 = vmatprep.mubr.bf16.mxu1 %v179_v48  ;;  %vm161_vm5 = vcmp.ge.f32.partialorder %v149_v46, 0.0  ;;  %p676_p11 = por %p675_p10, %p674_p9 }
  0xfb   :  { %v167_v54 = vmul.f32 0.99, %v141_v49  ;;  %v144_v55 = vadd.f32 %v508_v27, %v143_v53  ;;  %592 = vmatmul.mubr.bf16.vlgmr.msra.gmra.mrb[0].mxu1 %v180_v45  ;;  %vm159_vm6 = vcmp.ge.f32.partialorder %v141_v49, 0.0 }
  0xfc   :  { %vm162_vm7 = vcmp.ge.f32.partialorder %v152_v52, 0.0  ;;  %v170_v56 = vmul.f32 0.99, %v152_v52  ;;  %v177_v58 = vsel %vm161_vm5, %v149_v46, %v169_v51  ;;  %p677_p12 = pnand %p676_p11, %p670_p8 }
  0xfd   :  { %vm160_vm8 = vcmp.ge.f32.partialorder %v144_v55, 0.0  ;;  %v168_v57 = vmul.f32 0.99, %v144_v55  ;;  %v175_v60 = vsel %vm159_vm6, %v141_v49, %v167_v54 }
  0xfe   :  { %v178_v59 = vsel %vm162_vm7, %v152_v52, %v170_v56 }
  0xff   :  { %v176_v61 = vsel %vm160_vm8, %v144_v55, %v168_v57  ;;  %v182_v62 = vpack.c.bf16 %v178_v59, %v177_v58 }
 0x100   :  { %v181_v63 = vpack.c.bf16 %v176_v61, %v175_v60 }
 0x102   :  { %595 = vmatprep.mubr.bf16.mxu1 %v181_v63 }
 0x103   :  { %596 = vmatmul.mubr.bf16.gmra.mrb[4].mxu1 %v182_v62 }
 0x1ce   :  { %v593_v4 = vpop.f32.mrb[0].mxu1 }
 0x1cf   :  { %v297_v5 = vadd.f32 %v593_v4, %v515_v3  ;;  %v288_v6 = vpop.f32.mrb[1].mxu1 }
 0x1d0   :  { %v289_v7 = vadd.f32 %v515_v3, %v288_v6  ;;  %v594_v8 = vpop.f32.mrb[2].mxu1 }
 0x1d1   :  { %v329_v9 = vmul.f32 0.001, %v297_v5  ;;  %v300_v10 = vadd.f32 %v594_v8, %v515_v3  ;;  %v291_v11 = vpop.f32.mrb[3].mxu1  ;;  %vm321_vm9 = vcmp.ge.f32.partialorder %v297_v5, 0.0 }
 0x1d2   :  { %v327_v12 = vmul.f32 0.001, %v289_v7  ;;  %v292_v13 = vadd.f32 %v515_v3, %v291_v11  ;;  %vm319_vm10 = vcmp.ge.f32.partialorder %v289_v7, 0.0 }
 0x1d3   :  { %vm322_vm11 = vcmp.ge.f32.partialorder %v300_v10, 0.0  ;;  %v330_v14 = vmul.f32 0.001, %v300_v10  ;;  %v337_v16 = vsel %vm321_vm9, %v297_v5, %v329_v9 }
 0x1d4   :  { %vm320_vm12 = vcmp.ge.f32.partialorder %v292_v13, 0.0  ;;  %v328_v15 = vmul.f32 0.001, %v292_v13  ;;  %v335_v20 = vsel %vm319_vm10, %v289_v7, %v327_v12 }
 0x1d5   :  { %v338_v17 = vsel %vm322_vm11, %v300_v10, %v330_v14 }
 0x1d6   :  { %v344_v18 = vpack.c.bf16 %v338_v17, %v337_v16  ;;  %v597_v19 = vpop.f32.mrb[4].mxu1  ;;  %v336_v21 = vsel %vm320_vm12, %v292_v13, %v328_v15 }
 0x1d7   :  { %v313_v22 = vadd.f32 %v597_v19, %v515_v3  ;;  %v304_v23 = vpop.f32.mrb[5].mxu1  ;;  %v343_v24 = vpack.c.bf16 %v336_v21, %v335_v20 }
 0x1d8   :  { %v305_v25 = vadd.f32 %v515_v3, %v304_v23  ;;  %v598_v26 = vpop.f32.mrb[6].mxu1 }
 0x1d9   :  { %v333_v27 = vmul.f32 0.001, %v313_v22  ;;  %v316_v28 = vadd.f32 %v598_v26, %v515_v3  ;;  %v307_v29 = vpop.f32.mrb[7].mxu1  ;;  %615 = vmatprep.mubr.bf16.mxu0 %v343_v24  ;;  %vm325_vm13 = vcmp.ge.f32.partialorder %v313_v22, 0.0 }
 0x1da   :  { %v331_v30 = vmul.f32 0.001, %v305_v25  ;;  %v308_v31 = vadd.f32 %v515_v3, %v307_v29  ;;  %616 = vmatmul.mubr.bf16.vlgmr.msra.gmra.mrb[8].mxu0 %v344_v18  ;;  %vm323_vm14 = vcmp.ge.f32.partialorder %v305_v25, 0.0 }
 0x1db   :  { %vm326_vm15 = vcmp.ge.f32.partialorder %v316_v28, 0.0  ;;  %v334_v32 = vmul.f32 0.001, %v316_v28  ;;  %v341_v34 = vsel %vm325_vm13, %v313_v22, %v333_v27 }
 0x1dc   :  { %vm324_vm0 = vcmp.ge.f32.partialorder %v308_v31, 0.0  ;;  %v332_v33 = vmul.f32 0.001, %v308_v31  ;;  %v339_v36 = vsel %vm323_vm14, %v305_v25, %v331_v30 }
 0x1dd   :  { %v342_v35 = vsel %vm326_vm15, %v316_v28, %v334_v32 }
 0x1de   :  { %v340_v37 = vsel %vm324_vm0, %v308_v31, %v332_v33  ;;  %v346_v38 = vpack.c.bf16 %v342_v35, %v341_v34 }
 0x1df   :  { %v345_v39 = vpack.c.bf16 %v340_v37, %v339_v36 }
 0x1e1   :  { %619 = vmatprep.mubr.bf16.mxu0 %v345_v39 }
 0x1e2   :  { %620 = vmatmul.mubr.bf16.gmra.mrb[12].mxu0 %v346_v38 }
 0x2ad   :  { %v617_v41 = vpop.f32.mrb[8].mxu0 }
 0x2ae   :  { %v461_v42 = vadd.f32 %v617_v41, %v524_v40  ;;  %v452_v43 = vpop.f32.mrb[9].mxu0 }
 0x2af   :  { %v453_v44 = vadd.f32 %v524_v40, %v452_v43  ;;  %v618_v45 = vpop.f32.mrb[10].mxu0 }
 0x2b0   :  { %485 = vst [vmem:[#allocation5 + $0x10] sm:$0xff] %v461_v42  ;;  %v464_v46 = vadd.f32 %v618_v45, %v524_v40  ;;  %v455_v47 = vpop.f32.mrb[11].mxu0 }
 0x2b1   :  { %483 = vst [vmem:[#allocation5] sm:$0xff] %v453_v44  ;;  %v456_v48 = vadd.f32 %v524_v40, %v455_v47 }
 0x2b2   :  { %486 = vst [vmem:[#allocation5 + $0x18] sm:$0xff] %v464_v46 }
 0x2b3   :  { %484 = vst [vmem:[#allocation5 + $0x8] sm:$0xff] %v456_v48 }
 0x2b5   :  { %v621_v49 = vpop.f32.mrb[12].mxu0 }
 0x2b6   :  { %v477_v50 = vadd.f32 %v621_v49, %v524_v40  ;;  %v468_v51 = vpop.f32.mrb[13].mxu0 }
 0x2b7   :  { %v469_v52 = vadd.f32 %v524_v40, %v468_v51  ;;  %v622_v53 = vpop.f32.mrb[14].mxu0 }
 0x2b8   :  { %489 = vst [vmem:[#allocation5 + $0x30] sm:$0xff] %v477_v50  ;;  %v480_v54 = vadd.f32 %v622_v53, %v524_v40  ;;  %v471_v55 = vpop.f32.mrb[15].mxu0 }
 0x2b9   :  { %487 = vst [vmem:[#allocation5 + $0x20] sm:$0xff] %v469_v52  ;;  %v472_v56 = vadd.f32 %v524_v40, %v471_v55 }
 0x2ba   :  { %490 = vst [vmem:[#allocation5 + $0x38] sm:$0xff] %v480_v54 }
 0x2bb   :  { %488 = vst [vmem:[#allocation5 + $0x28] sm:$0xff] %v472_v56 }
 0x2bc   :  { %680 = shalt.err (!%p677_p12)
}
 0x2bd   :  { %s681_s30 = scalar_lea.hbm %s839_s7, 1024 }
 0x2be   :  { %p682_p13 = scmp.ne.s32.totalorder %s839_s7, %s681_s30  ;;  %p685_p0 = scmp.lt.u32.totalorder %s681_s30, %s839_s7 }
 0x2c0   :  { %p687_p1 = pnand %p685_p0, %p682_p13 }
 0x2c2   :  { %690 = shalt.err (!%p687_p1)
}
 0x2c3   :  { %s699_s12 = smov 128   ;;  %s700_s13 = smov 8  }
 0x2c4   :  { %502 = dma.vmem_to_hbm [thread:$0]  %s497_s27, 1024, %s839_s7, [#allocation4], %s699_s12, %s699_s12, %s700_s13  }
 0x2c5   :  { %693 = dma.done.wait [#allocation4], 1024  }
 0x2c6   :  { %694 = vsyncadd [#allocation4], 4294966272 }
 0x2c7   :  { %506 = vsyncpa [#allocation3], 1 }
 0x2c8   :  { %507 = vsyncpa [#allocation4], 1 }

</bundles_post_ra>
